<compile_context>
chip_gen: v7x
topology: tpu7x:2x2x1
jax: 0.10.0
libtpu: 0.0.40
codegen_flags: <defaults>
</compile_context>

<pallas_src>
import jax
import jax.numpy as jnp
from jax import lax
from jax.experimental import pallas as pl
from jax.experimental.pallas import tpu as pltpu

HIDDEN = 19  # fc0 output width, fixed by FC_origin


def _round_up(x, m):
    return ((x + m - 1) // m) * m


def _fc_origin_kernel(x_ref, w0_ref, b0_ref, w1_ref, b1_ref, o_ref):
    """One batch tile; batch rides the lane axis of every intermediate.

    x_ref  : [bb, D_in] f32   raw x tile (pipelined per grid step)
    w0_ref : [H, D_in]  f32   fc0 weight, PyTorch [out, in] layout (resident)
    b0_ref : [H, 1]     f32   fc0 bias column (broadcasts across lanes)
    w1_ref : [H, 1]     f32   fc1 weight column (== fc1.weight.T)
    b1_ref : [1]        f32   fc1 bias scalar (SMEM)
    o_ref  : [1, bb]    f32   lane-dense output row
    """
    # fc0 on the MXU: contract D_in of W0 with D_in of the x tile.  Result is
    # [H, bb] (batch on lanes) without any wrapper-side transpose; f32 in,
    # f32 accumulation — matches the PyTorch module's precision.
    h0 = lax.dot_general(
        w0_ref[...], x_ref[...],
        dimension_numbers=(((1,), (1,)), ((), ())),
        preferred_element_type=jnp.float32)
    # Bias + ReLU on the VPU in f32 (correct on v5e's no-bf16 VPU too).
    h0 = jnp.maximum(h0 + b0_ref[...], 0.0)
    # fc1 (19 -> 1) as a VPU weighted sum across the sublane axis.
    y = jnp.sum(h0 * w1_ref[...], axis=0, keepdims=True) + b1_ref[0]
    o_ref[...] = y.astype(o_ref.dtype)


def fc_origin_forward(x, params, *, block_b=8192):
    """x: [B, D_in] float32. Returns flattened [B] output (== torch.flatten)."""
    w0, b0, w1, b1 = params
    B, D_in = x.shape
    H = w0.shape[0]

    # ---- batch-tile sizing --------------------------------------------------
    # In VMEM the x tile [bb, D_in] is lane-padded to 128 and the [1, bb]
    # output row is sublane-padded to 8.  Pick the largest bb such that three
    # x buffers fit a ~40 MiB budget (leaves headroom under v7x's 64 MiB/TC).
    lane_din = _round_up(D_in, 128)
    x_budget = 40 << 20
    bb_cap = max(128, (x_budget // (3 * lane_din * 4)) // 128 * 128)
    bb = max(128, min(_round_up(block_b, 128), bb_cap, _round_up(B, 128)))

    # Keep >= 2 batch tiles when there is enough work so v7x's two
    # TensorCores (dimension_semantics="parallel") both get a share.
    if B > 128 and _round_up(B, bb) // bb < 2:
        bb = _round_up((B + 1) // 2, 128)

    B_pad = _round_up(B, bb)
    grid = (B_pad // bb,)

    x = x.astype(jnp.float32)
    if B_pad != B:
        # Zero-pad the batch up to whole tiles; padded rows only feed junk
        # output columns that are sliced off below.
        x = jnp.pad(x, ((0, B_pad - B), (0, 0)))

    w0_f = w0.astype(jnp.float32)                     # [H, D_in]
    b0_col = b0.reshape(H, 1).astype(jnp.float32)     # [H, 1]
    w1_col = w1.reshape(H, 1).astype(jnp.float32)     # [H, 1]
    b1_s = b1.reshape(1).astype(jnp.float32)          # [1] scalar -> SMEM

    # ---- VMEM budget derived from the actual buffers (v7x-safe) ------------
    x_buf = bb * lane_din * 4                          # one x tile buffer
    out_buf = 8 * bb * 4                               # [1, bb] padded to 8 sublanes
    sub_h = _round_up(H, 8)
    resident = 2 * (sub_h * lane_din + 2 * sub_h * 128) * 4   # W0, b0, w1
    vmem_limit = 3 * x_buf + 2 * out_buf + resident + (4 << 20)
    vmem_limit = int(min(max(vmem_limit, 32 << 20), 56 << 20))

    cost = pl.CostEstimate(
        flops=2 * B_pad * H * (D_in + 1),
        transcendentals=0,
        bytes_accessed=int(B_pad * D_in * 4 + B_pad * 4
                           + w0.size * 4 + (2 * H + 1) * 4),
    )

    def _run(x_spec):
        return pl.pallas_call(
            _fc_origin_kernel,
            out_shape=jax.ShapeDtypeStruct((1, B_pad), jnp.float32),
            grid_spec=pltpu.PrefetchScalarGridSpec(
                num_scalar_prefetch=0,
                grid=grid,
                in_specs=[
                    x_spec,                                              # x tile (pipelined)
                    pl.BlockSpec((H, D_in), lambda i: (0, 0)),           # W0 (resident)
                    pl.BlockSpec((H, 1), lambda i: (0, 0)),              # b0 (resident)
                    pl.BlockSpec((H, 1), lambda i: (0, 0)),              # w1 (resident)
                    pl.BlockSpec(memory_space=pltpu.MemorySpace.SMEM),   # b1 scalar
                ],
                out_specs=pl.BlockSpec((1, bb), lambda i: (0, i)),       # lane-dense row
            ),
            compiler_params=pltpu.CompilerParams(
                dimension_semantics=("parallel",),   # shards batch tiles on v7x's 2 TCs
                vmem_limit_bytes=vmem_limit,
            ),
            cost_estimate=cost,
        )(x, w0_f, b0_col, w1_col, b1_s)

    try:
        # 3-deep x pipeline: compute per step is one skinny MXU pass, so the
        # extra buffer hides DMA issue latency/jitter between steps.
        out = _run(pl.BlockSpec((bb, D_in), lambda i: (i, 0),
                                pipeline_mode=pl.Buffered(3)))
    except Exception:
        # Fallback for JAX builds without BlockSpec pipeline_mode support.
        out = _run(pl.BlockSpec((bb, D_in), lambda i: (i, 0)))

    # torch.flatten on [B, 1] -> [B]; drop the batch padding (glue).
    return out[0, :B]


def init_params(key, d_in, hidden=HIDDEN):
    """nn.Linear-style uniform(-1/sqrt(fan_in), 1/sqrt(fan_in)) init.
    Weights kept in PyTorch [out, in] layout (kernel computes W0 @ x^T)."""
    def linear(k, fan_in, fan_out):
        kw, kb = jax.random.split(k)
        bound = 1.0 / jnp.sqrt(jnp.float32(fan_in))
        w = jax.random.uniform(kw, (fan_out, fan_in), jnp.float32, -bound, bound)
        b = jax.random.uniform(kb, (fan_out,), jnp.float32, -bound, bound)
        return w, b

    k0, k1 = jax.random.split(key)
    w0, b0 = linear(k0, d_in, hidden)   # fc0: [19, D_in], [19]
    w1, b1 = linear(k1, hidden, 1)      # fc1: [1, 19],   [1]
    return (w0, b0, w1, b1)


def _reference(x, params):
    # Pure-f32 reference, matching PyTorch FC_origin semantics.
    w0, b0, w1, b1 = params
    h0 = jnp.maximum(x @ w0.T + b0[None, :], 0.0)
    y = h0 @ w1.T + b1[None, :]
    return y.reshape(-1)


if __name__ == "__main__":
    key = jax.random.PRNGKey(0)
    k_params, k_x = jax.random.split(key)

    B, D_in = 8, 16
    params = init_params(k_params, D_in)
    x = jax.random.normal(k_x, (B, D_in), jnp.float32)

    y = jax.block_until_ready(fc_origin_forward(x, params))
    y_ref = _reference(x, params)

    assert y.shape == (B,), y.shape
    assert jnp.allclose(y, y_ref, atol=1e-4, rtol=1e-4), (y, y_ref)

    print("KERNEL_OK")
</pallas_src>

<mosaic_0001>
module attributes {stable_mosaic.version = 11 : i64} {
  func.func @_fc_origin_kernel(%arg0: i32, %arg1: memref<128x16xf32, #tpu.memory_space<vmem>>, %arg2: memref<19x16xf32, #tpu.memory_space<vmem>>, %arg3: memref<19x1xf32, #tpu.memory_space<vmem>>, %arg4: memref<19x1xf32, #tpu.memory_space<vmem>>, %arg5: memref<1xf32, #tpu.memory_space<smem>>, %arg6: memref<1x128xf32, #tpu.memory_space<vmem>>) attributes {dimension_semantics = [#tpu.dimension_semantics<parallel>], iteration_bounds = array<i64: 1>, scalar_prefetch = 0 : i64, scratch_operands = 0 : i64, tpu.core_type = #tpu.core_type<tc>, window_params = [{transform_indices = @transform_0, window_bounds = array<i64: 128, 16>}, {pipeline_mode = #tpu.pipeline_mode<synchronous>, transform_indices = @transform_1, window_bounds = array<i64: 19, 16>}, {pipeline_mode = #tpu.pipeline_mode<synchronous>, transform_indices = @transform_2, window_bounds = array<i64: 19, 1>}, {pipeline_mode = #tpu.pipeline_mode<synchronous>, transform_indices = @transform_3, window_bounds = array<i64: 19, 1>}, {transform_indices = @transform_4, window_bounds = array<i64: 1>}, {transform_indices = @transform_5, window_bounds = array<i64: 1, 128>}]} {
    %c0 = arith.constant 0 : index
    %c0_0 = arith.constant 0 : index
    %0 = vector.load %arg2[%c0, %c0_0] : memref<19x16xf32, #tpu.memory_space<vmem>>, vector<19x16xf32>
    %c0_1 = arith.constant 0 : index
    %c0_2 = arith.constant 0 : index
    %1 = vector.load %arg1[%c0_1, %c0_2] : memref<128x16xf32, #tpu.memory_space<vmem>>, vector<128x16xf32>
    %cst = arith.constant dense<0.000000e+00> : vector<19x128xf32>
    %2 = tpu.matmul %0, %1, %cst {dimension_numbers = #tpu.dot_dimension_numbers<[1], [1], [0], [0], [0, 0, 1, 0], [], []>} : vector<19x16xf32>, vector<128x16xf32>, vector<19x128xf32> -> vector<19x128xf32>
    %c0_3 = arith.constant 0 : index
    %c0_4 = arith.constant 0 : index
    %3 = vector.load %arg3[%c0_3, %c0_4] : memref<19x1xf32, #tpu.memory_space<vmem>>, vector<19x1xf32>
    %4 = vector.broadcast %3 : vector<19x1xf32> to vector<19x128xf32>
    %5 = arith.addf %2, %4 : vector<19x128xf32>
    %cst_5 = arith.constant 0.000000e+00 : f32
    %6 = vector.broadcast %cst_5 : f32 to vector<19x128xf32>
    %7 = arith.maximumf %5, %6 : vector<19x128xf32>
    %c0_6 = arith.constant 0 : index
    %c0_7 = arith.constant 0 : index
    %8 = vector.load %arg4[%c0_6, %c0_7] : memref<19x1xf32, #tpu.memory_space<vmem>>, vector<19x1xf32>
    %9 = vector.broadcast %8 : vector<19x1xf32> to vector<19x128xf32>
    %10 = arith.mulf %7, %9 : vector<19x128xf32>
    %cst_8 = arith.constant dense<0.000000e+00> : vector<128xf32>
    %11 = vector.multi_reduction <add>, %10, %cst_8 [0] : vector<19x128xf32> to vector<128xf32>
    %12 = vector.shape_cast %11 : vector<128xf32> to vector<1x128xf32>
    %c0_9 = arith.constant 0 : index
    %13 = memref.load %arg5[%c0_9] : memref<1xf32, #tpu.memory_space<smem>>
    %14 = vector.broadcast %13 : f32 to vector<1x128xf32>
    %15 = arith.addf %12, %14 : vector<1x128xf32>
    %c0_10 = arith.constant 0 : index
    %c0_11 = arith.constant 0 : index
    %16 = vector.load %arg6[%c0_10, %c0_11] : memref<1x128xf32, #tpu.memory_space<vmem>>, vector<1x128xf32>
    tpu.vector_store %arg6[%c0_10, %c0_11], %15 {strides = array<i32>} : memref<1x128xf32, #tpu.memory_space<vmem>>, vector<1x128xf32>,
    return
  }
  func.func @transform_0(%arg0: i32) -> (i32, i32) {
    %c0_i32 = arith.constant 0 : i32
    %c0_i32_0 = arith.constant 0 : i32
    return %arg0, %c0_i32 : i32, i32
  }
  func.func @transform_1(%arg0: i32) -> (i32, i32) {
    %c0_i32 = arith.constant 0 : i32
    %c0_i32_0 = arith.constant 0 : i32
    %c0_i32_1 = arith.constant 0 : i32
    return %c0_i32, %c0_i32_0 : i32, i32
  }
  func.func @transform_2(%arg0: i32) -> (i32, i32) {
    %c0_i32 = arith.constant 0 : i32
    %c0_i32_0 = arith.constant 0 : i32
    %c0_i32_1 = arith.constant 0 : i32
    return %c0_i32, %c0_i32_0 : i32, i32
  }
  func.func @transform_3(%arg0: i32) -> (i32, i32) {
    %c0_i32 = arith.constant 0 : i32
    %c0_i32_0 = arith.constant 0 : i32
    %c0_i32_1 = arith.constant 0 : i32
    return %c0_i32, %c0_i32_0 : i32, i32
  }
  func.func @transform_4(%arg0: i32) -> i32 {
    %c0_i32 = arith.constant 0 : i32
    %c0_i32_0 = arith.constant 0 : i32
    return %c0_i32 : i32
  }
  func.func @transform_5(%arg0: i32) -> (i32, i32) {
    %c0_i32 = arith.constant 0 : i32
    %c0_i32_0 = arith.constant 0 : i32
    return %c0_i32, %arg0 : i32, i32
  }
}

</mosaic_0001>

<bundles_post_ra>
// kernel: tpu_custom_call.1
= control target key start
LH: loop header
LB: loop body
LE: loop exit
PB: predicated region body
PF: predicated region fallthrough
CT: control target
= control target key end

     0   :  { %vm59_vm0 = vcmask 130048   ;;  %v407_v2 = vmov 0.0|0.0   ;;  %vm408_vm2 = vmmov 0   ;;  %v409_v5 = vmov 0.0   ;;  %s595_s0 = inlined_call_operand.vmem [shape: f32[128,16], index: 0, kind: input, shape index: {}]   ;;  %s596_s1 = inlined_call_operand.vmem [shape: f32[19,16], index: 1, kind: input, shape index: {}]   ;;  %s597_s2 = inlined_call_operand.vmem [shape: f32[19,1], index: 2, kind: input, shape index: {}]   ;;  %s598_s3 = inlined_call_operand.vmem [shape: f32[19,1], index: 3, kind: input, shape index: {}]   ;;  %s599_s4 = inlined_call_operand.<no memory space> [shape: f32[1], index: 4, kind: input, shape index: {}]   ;;  %s600_s5 = inlined_call_operand.hbm [shape: f32[1,128], index: 5, kind: output, shape index: {}]  }
   0x1   :  { %v25_v0 = vld [vmem:[%s595_s0] sm:$0xff]  ;;  %v26_v1 = vld [vmem:[%s595_s0 + $0x8] sm:$0xff]  ;;  %328 = vmatprep.subr.bf16.mxu0 %v407_v2  ;;  %360 = vmatprep.subr.bf16.mxu1 %v407_v2  ;;  %vm452_vm1 = vmpackc.low %vm59_vm0, %vm59_vm0  ;;  %v410_v8 = vmov 0  }
   0x2   :  { %v329_v3 = vpack.c.bf16 %v26_v1, %v25_v0  ;;  %319 = vmatprep.mubr.msk.f32.mxu0 %vm408_vm2, %v409_v5  ;;  %322 = vmatprep.mubr.msk.f32.mxu1 %vm408_vm2, %v409_v5  ;;  %v27_v6 = vld [vmem:[%s595_s0 + $0x10] sm:$0xff]  ;;  %v28_v7 = vld [vmem:[%s595_s0 + $0x18] sm:$0xff]  ;;  %v41_v9 = vld [vmem:[%s597_s2] sm:$0xff] }
   0x3   :  { %381 = vset.pattern.permute.xlu0 %v410_v8  ;;  %382 = vset.pattern.permute.xlu1 %v410_v8  ;;  %v333_v10 = vpack.c.bf16 %v28_v7, %v27_v6  ;;  %v43_v11 = vld [vmem:[%s597_s2 + $0x10] sm:$0x7] }
   0x4   :  { %331 = vmatpush3.bf16.xpose.msk.msra.mxu0 %vm452_vm1, %v329_v3  ;;  %368 = vmatpush3.bf16.xpose.msk.msra.mxu1 %vm452_vm1, %v329_v3 }
   0x5   :  { %332 = vmatprep.subr.bf16.mxu0 %v407_v2  ;;  %361 = vmatprep.subr.bf16.mxu1 %v407_v2 }
   0x6   :  { %46 = vperm.xlu0 %381, %v41_v9   ;;  %56 = vperm.xlu1 %382, %v43_v11  }
   0x7   :  { %11 = vsyncpa [#allocation4], 0  ;;  %v42_v12 = vld [vmem:[%s597_s2 + $0x8] sm:$0xff]  ;;  %v200_v13 = vld [vmem:[%s598_s3] sm:$0xff]  ;;  %vm222_vm3 = vcmask 1042432   ;;  %s411_s15 = smov [#allocation3]  }
   0x8   :  { %v29_v14 = vld [vmem:[%s595_s0 + $0x20] sm:$0xff]  ;;  %v30_v15 = vld [vmem:[%s595_s0 + $0x28] sm:$0xff]  ;;  %v202_v17 = vld [vmem:[%s598_s3 + $0x10] sm:$0x7]  ;;  %s241_s16 = sshll.u32 %s411_s15, 4  ;;  %s242_s16 = int_to_ptr.vmem [resolvable:$true] %s241_s16 }
   0x9   :  { %v201_v16 = vld [vmem:[%s598_s3 + $0x8] sm:$0xff]  ;;  %v337_v18 = vpack.c.bf16 %v30_v15, %v29_v14  ;;  %v31_v19 = vld [vmem:[%s595_s0 + $0x30] sm:$0xff]  ;;  %v32_v20 = vld [vmem:[%s595_s0 + $0x38] sm:$0xff]  ;;  %s383_s17 = scalar_lea.vmem %s242_s16, 16  ;;  %s387_s18 = scalar_lea.vmem %s242_s16, 32 }
   0xa   :  { %51 = vperm.xlu0 %381, %v42_v12   ;;  %205 = vperm.xlu1 %382, %v200_v13   ;;  %v341_v21 = vpack.c.bf16 %v32_v20, %v31_v19  ;;  %v33_v22 = vld [vmem:[%s595_s0 + $0x40] sm:$0xff]  ;;  %v34_v23 = vld [vmem:[%s595_s0 + $0x48] sm:$0xff]  ;;  %v35_v25 = vld [vmem:[%s595_s0 + $0x50] sm:$0xff]  ;;  %p384_p0 = scmp.ne.s32.totalorder %s242_s16, %s383_s17  ;;  %p388_p1 = scmp.lt.s32.totalorder %s242_s16, %s242_s16 }
   0xb   :  { %v345_v24 = vpack.c.bf16 %v34_v23, %v33_v22  ;;  %v36_v26 = vld [vmem:[%s595_s0 + $0x58] sm:$0xff]  ;;  %v37_v28 = vld [vmem:[%s595_s0 + $0x60] sm:$0xff]  ;;  %v38_v29 = vld [vmem:[%s595_s0 + $0x68] sm:$0xff]  ;;  %p389_p2 = scmp.lt.s32.totalorder %s387_s18, %s383_s17 }
   0xc   :  { %335 = vmatpush3.bf16.xpose.msk.msra.mxu0 %vm452_vm1, %v333_v10  ;;  %369 = vmatpush3.bf16.xpose.msk.msra.mxu1 %vm452_vm1, %v333_v10  ;;  %v349_v27 = vpack.c.bf16 %v36_v26, %v35_v25  ;;  %v353_v30 = vpack.c.bf16 %v38_v29, %v37_v28  ;;  %v39_v31 = vld [vmem:[%s595_s0 + $0x70] sm:$0xff]  ;;  %v40_v32 = vld [vmem:[%s595_s0 + $0x78] sm:$0xff]  ;;  %v22_v34 = vld [vmem:[%s596_s1] sm:$0xff] }
   0xd   :  { %336 = vmatprep.subr.bf16.mxu0 %v407_v2  ;;  %362 = vmatprep.subr.bf16.mxu1 %v407_v2  ;;  %v357_v33 = vpack.c.bf16 %v40_v32, %v39_v31  ;;  %v23_v35 = vld [vmem:[%s596_s1 + $0x8] sm:$0xff]  ;;  %v24_v36 = vld [vmem:[%s596_s1 + $0x10] sm:$0x7]  ;;  %p390_p3 = por %p389_p2, %p388_p1 }
   0xe   :  { %210 = vperm.xlu0 %381, %v201_v16   ;;  %215 = vperm.xlu1 %382, %v202_v17  }
   0xf   :  { %p391_p4 = pnand %p390_p3, %p384_p0 }
  0x14   :  { %339 = vmatpush3.bf16.xpose.msk.msra.mxu0 %vm452_vm1, %v337_v18  ;;  %370 = vmatpush3.bf16.xpose.msk.msra.mxu1 %vm452_vm1, %v337_v18 }
  0x15   :  { %340 = vmatprep.subr.bf16.mxu0 %v407_v2  ;;  %363 = vmatprep.subr.bf16.mxu1 %v407_v2 }
  0x1c   :  { %343 = vmatpush3.bf16.xpose.msk.msra.mxu0 %vm452_vm1, %v341_v21  ;;  %371 = vmatpush3.bf16.xpose.msk.msra.mxu1 %vm452_vm1, %v341_v21 }
  0x1d   :  { %344 = vmatprep.subr.bf16.mxu0 %v407_v2  ;;  %364 = vmatprep.subr.bf16.mxu1 %v407_v2 }
  0x24   :  { %347 = vmatpush3.bf16.xpose.msk.msra.mxu0 %vm452_vm1, %v345_v24  ;;  %372 = vmatpush3.bf16.xpose.msk.msra.mxu1 %vm452_vm1, %v345_v24 }
  0x25   :  { %348 = vmatprep.subr.bf16.mxu0 %v407_v2  ;;  %365 = vmatprep.subr.bf16.mxu1 %v407_v2 }
  0x2c   :  { %351 = vmatpush3.bf16.xpose.msk.msra.mxu0 %vm452_vm1, %v349_v27  ;;  %373 = vmatpush3.bf16.xpose.msk.msra.mxu1 %vm452_vm1, %v349_v27 }
  0x2d   :  { %352 = vmatprep.subr.bf16.mxu0 %v407_v2  ;;  %366 = vmatprep.subr.bf16.mxu1 %v407_v2 }
  0x34   :  { %355 = vmatpush3.bf16.xpose.msk.msra.mxu0 %vm452_vm1, %v353_v30  ;;  %374 = vmatpush3.bf16.xpose.msk.msra.mxu1 %vm452_vm1, %v353_v30 }
  0x35   :  { %356 = vmatprep.subr.bf16.mxu0 %v407_v2  ;;  %367 = vmatprep.subr.bf16.mxu1 %v407_v2  ;;  %v232_v2 = vstv %s599_s4 }
  0x3c   :  { %359 = vmatpush3.bf16.xpose.msk.msra.mxu0 %vm452_vm1, %v357_v33  ;;  %375 = vmatpush3.bf16.xpose.msk.msra.mxu1 %vm452_vm1, %v357_v33 }
  0x43   :  { %320 = vmatmul.mubr.msk.f32.vlgmr.msra.gmra.mrb[0].mxu0 %vm59_vm0, %v22_v34  ;;  %323 = vmatmul.mubr.msk.f32.vlgmr.msra.gmra.mrb[0].mxu1 %vm59_vm0, %v23_v35 }
  0x44   :  { %325 = vmatprep.mubr.msk.f32.mxu1 %vm408_vm2, %v409_v5 }
  0x47   :  { %326 = vmatmul.mubr.msk.f32.gmra.mrb[2].mxu1 %vm59_vm0, %v24_v36 }
  0x85   :  { %v47_v37 = vpop.permute.xlu0 %46  ;;  %v57_v38 = vpop.permute.xlu1 %56 }
  0x89   :  { %v52_v39 = vpop.permute.xlu0 %51  ;;  %v206_v46 = vpop.permute.xlu1 %205 }
  0x8d   :  { %v211_v49 = vpop.permute.xlu0 %210  ;;  %v216_v57 = vpop.permute.xlu1 %215 }
 0x116   :  { %v183_v40 = vpop.f32.mrb[0].mxu0  ;;  %v188_v41 = vpop.f32.mrb[0].mxu1 }
 0x117   :  { %v184_v42 = vadd.f32 %v183_v40, %v47_v37  ;;  %v189_v43 = vadd.f32 %v188_v41, %v52_v39  ;;  %v324_v44 = vpop.f32.mrb[1].mxu1  ;;  %v321_v45 = vpop.f32.mrb[1].mxu0 }
 0x119   :  { %v197_v47 = vmax.f32 %v184_v42, 0.0  ;;  %v198_v48 = vmax.f32 %v189_v43, 0.0 }
 0x11a   :  { %v193_v50 = vpop.f32.mrb[2].mxu1 }
 0x11b   :  { %v218_v51 = vmul.f32 %v206_v46, %v197_v47  ;;  %v219_v52 = vmul.f32 %v211_v49, %v198_v48  ;;  %v194_v53 = vadd.f32 %v193_v50, %v57_v38  ;;  %v327_v54 = vpop.f32.mrb[3].mxu1 }
 0x11d   :  { %v221_v55 = vadd.f32 %v219_v52, %v218_v51  ;;  %v199_v56 = vmax.f32 %v194_v53, 0.0 }
 0x11f   :  { %v220_v58 = vmul.f32 %v216_v57, %v199_v56 }
 0x121   :  { %v223_v59 = vsel %vm222_vm3, %v220_v58, 0.0 }
 0x122   :  { %v224_v60 = vadd.f32 %v223_v59, %v221_v55 }
 0x124   :  { %v225_v61 = vrot.slane %v224_v60, 4 }
 0x126   :  { %v226_v62 = vadd.f32 %v225_v61, %v224_v60 }
 0x128   :  { %v227_v63 = vrot.slane %v226_v62, 2 }
 0x12a   :  { %v228_v0 = vadd.f32 %v227_v63, %v226_v62 }
 0x12c   :  { %v229_v1 = vrot.slane %v228_v0, 1 }
 0x12e   :  { %v230_v3 = vadd.f32 %v229_v1, %v228_v0 }
 0x130   :  { %v233_v4 = vadd.f32 %v232_v2, %v230_v3 }
 0x132   :  { %234 = vst [vmem:[#allocation3] sm:$0x1] %v233_v4 }
 0x133   :  { %394 = shalt.err (!%p391_p4)
}
 0x134   :  { %s395_s20 = scalar_lea.hbm %s600_s5, 16 }
 0x135   :  { %p396_p5 = scmp.ne.s32.totalorder %s600_s5, %s395_s20  ;;  %p399_p6 = scmp.lt.u32.totalorder %s395_s20, %s600_s5 }
 0x137   :  { %p401_p7 = pnand %p399_p6, %p396_p5 }
 0x139   :  { %404 = shalt.err (!%p401_p7)
}
 0x13a   :  { %244 = dma.vmem_to_hbm [thread:$0]  %s242_s16, 16, %s600_s5, [#allocation4]  }
 0x13b   :  { %405 = dma.done.wait [#allocation4], 16  }
 0x13c   :  { %406 = vsyncadd [#allocation4], 4294967280 }
 0x13d   :  { %248 = vsyncpa [#allocation4], 1 }

</bundles_post_ra>
